<compile_context>
chip_gen: v6e
topology: v6e:2x2x1
jax: 0.10.0
libtpu: 0.0.40
codegen_flags: <defaults>
</compile_context>

<pallas_src>
import functools

import jax
import jax.numpy as jnp
from jax import lax
from jax.experimental import pallas as pl
from jax.experimental.pallas import tpu as pltpu

LANES = 128
SUBLANES = 8


def _elementwise_loss(pred_f32, true_f32, gamma):
    """loss = (1 - exp(-|t-p|))**gamma * |t-p|**2   (alpha folded out)."""
    err = jnp.abs(true_f32 - pred_f32)
    w = 1.0 - jnp.exp(-err)              # single EUP transcendental / element
    if gamma == 2.0:
        t = w * err                      # (w*err)^2 == w^2*err^2 ; saves a VPU mul
        return t * t
    elif gamma == 1.0:
        return (w * err) * err
    else:
        return (w ** gamma) * (err * err)   # general path


def _focal_mse_kernel(pred_ref, true_ref, out_ref, *, gamma, rows_valid,
                      block_rows, need_mask):
    s = pl.program_id(1)

    @pl.when(s == 0)
    def _():
        out_ref[...] = jnp.zeros_like(out_ref)

    # Elementwise hot path: upcast in-register, pure VPU math + one EUP exp.
    pred = pred_ref[...].astype(jnp.float32)
    true = true_ref[...].astype(jnp.float32)
    loss = _elementwise_loss(pred, true, gamma)

    def accumulate(x):
        # Vreg-shaped accumulation: sublane-group adds only (no XLU, no masked
        # scalar stores) in the hot loop.  Output block index is constant
        # across the reduction axis, so this stays resident in VMEM per core.
        out_ref[...] += x.reshape(1, -1, SUBLANES, LANES).sum(axis=1)

    if need_mask:
        # Only the ragged last block and any clamped duplicate tail blocks pay
        # for the iota/compare/select; full blocks accumulate unmasked.
        blk = pl.program_id(0) * pl.num_programs(1) + s   # LOGICAL block index
        is_tail = (blk + 1) * block_rows > rows_valid

        @pl.when(is_tail)
        def _():
            row_ids = lax.broadcasted_iota(jnp.int32, loss.shape, 0)
            mask = (blk * block_rows + row_ids) < rows_valid
            accumulate(jnp.where(mask, loss, 0.0))

        @pl.when(jnp.logical_not(is_tail))
        def _():
            accumulate(loss)
    else:
        accumulate(loss)


def focal_mse_loss(y_pred, y_true, alpha=1.0, gamma=2.0, reduction="mean",
                   block_rows=None, num_cores=2):
    """Pallas TPU FocalMSELoss. Returns a scalar for 'mean'/'sum'."""
    assert y_pred.shape == y_true.shape
    if reduction not in ("mean", "sum"):
        # TODO(synk): reduction='none' (returning the full loss map) is not
        # implemented in this single-scalar reduction kernel.
        raise NotImplementedError("Only 'mean' and 'sum' reductions supported.")

    gamma = float(gamma)
    n_elems = int(y_pred.size)
    itemsize = jnp.dtype(y_pred.dtype).itemsize

    # Flatten in the ORIGINAL dtype (free reshape of a contiguous buffer).
    pred_flat = jnp.ravel(y_pred)
    true_flat = jnp.ravel(y_true)

    # Sublane-pack alignment for this dtype: 8 (f32), 16 (bf16/f16), 32 (int8).
    row_align = max(SUBLANES, 32 // itemsize)

    rows_total = n_elems // LANES
    rows_main = (rows_total // row_align) * row_align
    main_elems = rows_main * LANES

    kernel_sum = jnp.float32(0.0)

    # ------------------- main (aligned) part: Pallas kernel -----------------
    if rows_main > 0:
        if main_elems == n_elems:
            pred2d = pred_flat.reshape(rows_main, LANES)    # free view
            true2d = true_flat.reshape(rows_main, LANES)
        else:
            pred2d = lax.slice(pred_flat, (0,), (main_elems,)).reshape(rows_main, LANES)
            true2d = lax.slice(true_flat, (0,), (main_elems,)).reshape(rows_main, LANES)

        # Tile selection: ~2 MiB per input tile, rounded to the sublane pack.
        if block_rows is None:
            brows = (2 * 1024 * 1024) // (LANES * itemsize)  # 4096 f32, 8192 bf16
        else:
            brows = int(block_rows)
        brows = max(row_align, min(brows, rows_main))
        brows = (brows // row_align) * row_align

        total_blocks = pl.cdiv(rows_main, brows)
        ncores = num_cores if total_blocks >= num_cores else 1
        steps_per_core = pl.cdiv(total_blocks, ncores)
        need_mask = (rows_main % brows != 0) or (ncores * steps_per_core != total_blocks)
        last_block = total_blocks - 1

        def in_map(c, s):
            # Clamp so DMAs stay in bounds; over-read (duplicate) blocks are
            # fully masked in-kernel using the logical, unclamped index.
            return (jnp.minimum(c * steps_per_core + s, last_block), 0)

        kernel = functools.partial(
            _focal_mse_kernel,
            gamma=gamma,
            rows_valid=rows_main,
            block_rows=brows,
            need_mask=need_mask,
        )

        cost = pl.CostEstimate(
            flops=6 * main_elems,
            transcendentals=main_elems,
            bytes_accessed=2 * main_elems * itemsize + ncores * SUBLANES * LANES * 4,
        )

        partials = pl.pallas_call(
            kernel,
            out_shape=jax.ShapeDtypeStruct((ncores, SUBLANES, LANES), jnp.float32),
            grid_spec=pltpu.PrefetchScalarGridSpec(
                num_scalar_prefetch=0,
                grid=(ncores, steps_per_core),
                in_specs=[
                    pl.BlockSpec((brows, LANES), in_map),
                    pl.BlockSpec((brows, LANES), in_map),
                ],
                out_specs=pl.BlockSpec((1, SUBLANES, LANES), lambda c, s: (c, 0, 0)),
            ),
            compiler_params=pltpu.CompilerParams(
                dimension_semantics=("parallel", "arbitrary"),
                vmem_limit_bytes=32 * 1024 * 1024,
            ),
            cost_estimate=cost,
        )(pred2d, true2d)

        kernel_sum = jnp.sum(partials)          # single tiny cross-lane reduce

    # --------------- tiny unaligned tail: plain jnp in the wrapper ----------
    if main_elems != n_elems:
        tp = lax.slice(pred_flat, (main_elems,), (n_elems,)).astype(jnp.float32)
        tt = lax.slice(true_flat, (main_elems,), (n_elems,)).astype(jnp.float32)
        kernel_sum = kernel_sum + jnp.sum(_elementwise_loss(tp, tt, gamma))

    total = jnp.float32(alpha) * kernel_sum     # alpha applied once, exactly
    if reduction == "mean":
        return total / jnp.float32(n_elems)
    return total


def focal_mse_loss_ref(y_pred, y_true, alpha=1.0, gamma=2.0, reduction="mean"):
    """Pure-JAX reference matching the PyTorch module."""
    y_pred = y_pred.astype(jnp.float32)
    y_true = y_true.astype(jnp.float32)
    err = jnp.abs(y_true - y_pred)
    fw = alpha * (1.0 - jnp.exp(-err)) ** gamma
    loss = fw * err ** 2
    return jnp.mean(loss) if reduction == "mean" else jnp.sum(loss)


if __name__ == "__main__":
    key = jax.random.PRNGKey(0)
    k1, k2, k3, k4, k5, k6 = jax.random.split(key, 6)

    # Test 1: NCHW-like shape, default mean reduction (aligned, single block).
    shape = (2, 4, 16, 16)
    y_pred = jax.random.normal(k1, shape, dtype=jnp.float32)
    y_true = jax.random.normal(k2, shape, dtype=jnp.float32)
    out = focal_mse_loss(y_pred, y_true, alpha=1.0, gamma=2.0, reduction="mean")
    out = jax.block_until_ready(out)
    ref = focal_mse_loss_ref(y_pred, y_true, reduction="mean")
    assert jnp.allclose(out, ref, rtol=1e-5, atol=1e-6), (out, ref)

    # Test 2: odd-sized tensor, sum reduction, small tiles -> exercises the
    # wrapper tail path, the ragged/clamped-block pl.when mask, and the
    # 2-way core split.
    shape2 = (3, 5, 33, 17)
    y_pred2 = jax.random.normal(k3, shape2, dtype=jnp.float32)
    y_true2 = jax.random.normal(k4, shape2, dtype=jnp.float32)
    out2 = focal_mse_loss(y_pred2, y_true2, alpha=0.7, gamma=2.0,
                          reduction="sum", block_rows=24)
    out2 = jax.block_until_ready(out2)
    ref2 = focal_mse_loss_ref(y_pred2, y_true2, alpha=0.7, gamma=2.0,
                              reduction="sum")
    assert jnp.allclose(out2, ref2, rtol=1e-4, atol=1e-5), (out2, ref2)

    # Test 3: bf16 inputs (in-register upcast, 16-row sublane pack), mean.
    shape3 = (4, 8, 64)
    y_pred3 = jax.random.normal(k5, shape3, dtype=jnp.bfloat16)
    y_true3 = jax.random.normal(k6, shape3, dtype=jnp.bfloat16)
    out3 = focal_mse_loss(y_pred3, y_true3, alpha=1.0, gamma=2.0,
                          reduction="mean")
    out3 = jax.block_until_ready(out3)
    ref3 = focal_mse_loss_ref(y_pred3, y_true3, reduction="mean")
    assert jnp.allclose(out3, ref3, rtol=1e-3, atol=1e-5), (out3, ref3)

    print("KERNEL_OK")
</pallas_src>

<mosaic_0001>
module attributes {stable_mosaic.version = 11 : i64} {
  func.func @_focal_mse_kernel(%arg0: i32, %arg1: i32, %arg2: memref<16x128xf32, #tpu.memory_space<vmem>>, %arg3: memref<16x128xf32, #tpu.memory_space<vmem>>, %arg4: memref<1x8x128xf32, #tpu.memory_space<vmem>>) attributes {dimension_semantics = [#tpu.dimension_semantics<parallel>, #tpu.dimension_semantics<arbitrary>], iteration_bounds = array<i64: 1, 1>, scalar_prefetch = 0 : i64, scratch_operands = 0 : i64, tpu.core_type = #tpu.core_type<tc>, window_params = [{transform_indices = @transform_0, window_bounds = array<i64: 16, 128>}, {transform_indices = @transform_1, window_bounds = array<i64: 16, 128>}, {transform_indices = @transform_2, window_bounds = array<i64: 1, 8, 128>}]} {
    %c0_i32 = arith.constant 0 : i32
    %0 = arith.cmpi eq, %arg1, %c0_i32 : i32
    %1 = arith.extui %0 : i1 to i32
    %c0_i32_0 = arith.constant 0 : i32
    %2 = arith.cmpi ne, %1, %c0_i32_0 : i32
    scf.if %2 {
      %cst_12 = arith.constant 0.000000e+00 : f32
      %19 = vector.broadcast %cst_12 : f32 to vector<1x8x128xf32>
      %c0_13 = arith.constant 0 : index
      %c0_14 = arith.constant 0 : index
      %c0_15 = arith.constant 0 : index
      %20 = vector.load %arg4[%c0_13, %c0_14, %c0_15] : memref<1x8x128xf32, #tpu.memory_space<vmem>>, vector<1x8x128xf32>
      tpu.vector_store %arg4[%c0_13, %c0_14, %c0_15], %19 {strides = array<i32>} : memref<1x8x128xf32, #tpu.memory_space<vmem>>, vector<1x8x128xf32>,
    } else {
    }
    %c0 = arith.constant 0 : index
    %c0_1 = arith.constant 0 : index
    %3 = vector.load %arg2[%c0, %c0_1] : memref<16x128xf32, #tpu.memory_space<vmem>>, vector<16x128xf32>
    %c0_2 = arith.constant 0 : index
    %c0_3 = arith.constant 0 : index
    %4 = vector.load %arg3[%c0_2, %c0_3] : memref<16x128xf32, #tpu.memory_space<vmem>>, vector<16x128xf32>
    %5 = arith.subf %4, %3 : vector<16x128xf32>
    %6 = math.absf %5 : vector<16x128xf32>
    %cst = arith.constant 0.000000e+00 : f32
    %7 = vector.broadcast %cst : f32 to vector<16x128xf32>
    %8 = arith.subf %7, %6 : vector<16x128xf32>
    %9 = math.exp %8 : vector<16x128xf32>
    %cst_4 = arith.constant 1.000000e+00 : f32
    %10 = vector.broadcast %cst_4 : f32 to vector<16x128xf32>
    %11 = arith.subf %10, %9 : vector<16x128xf32>
    %12 = arith.mulf %11, %6 : vector<16x128xf32>
    %13 = arith.mulf %12, %12 : vector<16x128xf32>
    %c0_5 = arith.constant 0 : index
    %c0_6 = arith.constant 0 : index
    %c0_7 = arith.constant 0 : index
    %14 = vector.load %arg4[%c0_5, %c0_6, %c0_7] : memref<1x8x128xf32, #tpu.memory_space<vmem>>, vector<1x8x128xf32>
    %15 = vector.shape_cast %13 : vector<16x128xf32> to vector<1x2x8x128xf32>
    %cst_8 = arith.constant dense<0.000000e+00> : vector<1x8x128xf32>
    %16 = vector.multi_reduction <add>, %15, %cst_8 [1] : vector<1x2x8x128xf32> to vector<1x8x128xf32>
    %17 = arith.addf %14, %16 : vector<1x8x128xf32>
    %c0_9 = arith.constant 0 : index
    %c0_10 = arith.constant 0 : index
    %c0_11 = arith.constant 0 : index
    %18 = vector.load %arg4[%c0_9, %c0_10, %c0_11] : memref<1x8x128xf32, #tpu.memory_space<vmem>>, vector<1x8x128xf32>
    tpu.vector_store %arg4[%c0_9, %c0_10, %c0_11], %17 {strides = array<i32>} : memref<1x8x128xf32, #tpu.memory_space<vmem>>, vector<1x8x128xf32>,
    return
  }
  func.func @transform_0(%arg0: i32, %arg1: i32) -> (i32, i32) {
    %c1_i32 = arith.constant 1 : i32
    %0 = arith.muli %arg0, %c1_i32 : i32
    %1 = arith.addi %0, %arg1 : i32
    %c0_i32 = arith.constant 0 : i32
    %2 = arith.minsi %1, %c0_i32 : i32
    %c0_i32_0 = arith.constant 0 : i32
    %c0_i32_1 = arith.constant 0 : i32
    return %2, %c0_i32_0 : i32, i32
  }
  func.func @transform_1(%arg0: i32, %arg1: i32) -> (i32, i32) {
    %c1_i32 = arith.constant 1 : i32
    %0 = arith.muli %arg0, %c1_i32 : i32
    %1 = arith.addi %0, %arg1 : i32
    %c0_i32 = arith.constant 0 : i32
    %2 = arith.minsi %1, %c0_i32 : i32
    %c0_i32_0 = arith.constant 0 : i32
    %c0_i32_1 = arith.constant 0 : i32
    return %2, %c0_i32_0 : i32, i32
  }
  func.func @transform_2(%arg0: i32, %arg1: i32) -> (i32, i32, i32) {
    %c0_i32 = arith.constant 0 : i32
    %c0_i32_0 = arith.constant 0 : i32
    %c0_i32_1 = arith.constant 0 : i32
    return %arg0, %c0_i32, %c0_i32_0 : i32, i32, i32
  }
}

</mosaic_0001>

<bundles_post_ra>
// kernel: tpu_custom_call.1
= control target key start
LH: loop header
LB: loop body
LE: loop exit
PB: predicated region body
PF: predicated region fallthrough
CT: control target
= control target key end

     0   :  { %7 = vsyncpa [#allocation3], 0  ;;  %s214_s0 = inlined_call_operand.hbm [shape: f32[16,128], index: 0, kind: input, shape index: {}]   ;;  %s215_s1 = inlined_call_operand.hbm [shape: f32[16,128], index: 1, kind: input, shape index: {}]   ;;  %s216_s2 = inlined_call_operand.hbm [shape: f32[1,8,128], index: 2, kind: output, shape index: {}]  }
   0x1   :  { %8 = vsyncpa [#allocation6], 0 }
   0x2   :  { %9 = vsyncpa [#allocation4], 0  ;;  %s185_s9 = smov [#allocation2]  }
   0x3   :  { %s21_s10 = sshll.u32 %s185_s9, 4  ;;  %s22_s10 = int_to_ptr.vmem [resolvable:$true] %s21_s10 }
   0x4   :  { %s127_s11 = scalar_lea.vmem %s22_s10, 256  ;;  %p132_p1 = scmp.lt.s32.totalorder %s22_s10, %s22_s10 }
   0x5   :  { %p128_p0 = scmp.ne.s32.totalorder %s22_s10, %s127_s11  ;;  %p133_p2 = scmp.lt.s32.totalorder %s127_s11, %s127_s11 }
   0x7   :  { %p134_p3 = por %p133_p2, %p132_p1 }
   0x9   :  { %p135_p4 = pnand %p134_p3, %p128_p0 }
   0xb   :  { %138 = shalt.err (!%p135_p4)
}
   0xc   :  { %s186_s12 = smov 128   ;;  %s187_s13 = smov 8  }
   0xd   :  { %27 = dma.hbm_to_vmem [thread:$0]  %s214_s0, 256, %s22_s10, [#allocation3], %s186_s12, %s186_s12, %s187_s13  }
   0xe   :  { %s188_s16 = smov [#allocation5]  }
   0xf   :  { %s39_s17 = sshll.u32 %s188_s16, 4  ;;  %s40_s17 = int_to_ptr.vmem [resolvable:$true] %s39_s17 }
  0x10   :  { %s147_s18 = scalar_lea.vmem %s40_s17, 256  ;;  %p152_p6 = scmp.lt.s32.totalorder %s40_s17, %s40_s17 }
  0x11   :  { %p148_p5 = scmp.ne.s32.totalorder %s40_s17, %s147_s18  ;;  %p153_p7 = scmp.lt.s32.totalorder %s147_s18, %s147_s18 }
  0x13   :  { %p154_p8 = por %p153_p7, %p152_p6 }
  0x15   :  { %p155_p9 = pnand %p154_p8, %p148_p5 }
  0x17   :  { %158 = shalt.err (!%p155_p9)
}
  0x18   :  { %45 = dma.hbm_to_vmem [thread:$0]  %s215_s1, 256, %s40_s17, [#allocation6], %s186_s12, %s186_s12, %s187_s13  }
  0x19   :  { %179 = dma.done.wait [#allocation3], 256  }
  0x1a   :  { %180 = vsyncadd [#allocation3], 4294967040 }
  0x1b   :  { %181 = dma.done.wait [#allocation6], 256  }
  0x1c   :  { %182 = vsyncadd [#allocation6], 4294967040  ;;  %v65_v0 = vld [vmem:[#allocation2] sm:$0xff]  ;;  %v66_v1 = vld [vmem:[#allocation2 + $0x8] sm:$0xff]  ;;  %s189_s0 = smov [#allocation7]  }
  0x1d   :  { %v67_v2 = vld [vmem:[#allocation5] sm:$0xff]  ;;  %v68_v3 = vld [vmem:[#allocation5 + $0x8] sm:$0xff]  ;;  %s95_s1 = sshll.u32 %s189_s0, 4  ;;  %s96_s1 = int_to_ptr.vmem [resolvable:$true] %s95_s1 }
  0x1e   :  { %v69_v4 = vsub.f32 %v67_v2, %v65_v0  ;;  %v70_v5 = vsub.f32 %v68_v3, %v66_v1  ;;  %s159_s21 = scalar_lea.vmem %s96_s1, 128  ;;  %p164_p11 = scmp.lt.s32.totalorder %s96_s1, %s96_s1 }
  0x1f   :  { %p160_p10 = scmp.ne.s32.totalorder %s96_s1, %s159_s21  ;;  %p165_p12 = scmp.lt.s32.totalorder %s159_s21, %s159_s21 }
  0x20   :  { %v71_v6 = vand.u32 2147483647, %v69_v4  ;;  %v72_v7 = vand.u32 2147483647, %v70_v5 }
  0x21   :  { %p166_p13 = por %p165_p12, %p164_p11 }
  0x22   :  { %v73_v8 = vsub.f32 0.0, %v71_v6  ;;  %v74_v9 = vsub.f32 0.0, %v72_v7 }
  0x23   :  { %p167_p0 = pnand %p166_p13, %p160_p10 }
  0x24   :  { %v75_v10 = vmul.f32 1.442695, %v73_v8  ;;  %v77_v11 = vmul.f32 1.442695, %v74_v9 }
  0x26   :  { %115 = vpow2.f32 %v75_v10 }
  0x27   :  { %117 = vpow2.f32 %v77_v11 }
  0x33   :  { %v116_v12 = vpop.eup %115 }
  0x34   :  { %v118_v13 = vpop.eup %117  ;;  %v79_v14 = vsub.f32 1.0, %v116_v12 }
  0x35   :  { %v80_v15 = vsub.f32 1.0, %v118_v13 }
  0x36   :  { %v81_v16 = vmul.f32 %v79_v14, %v71_v6 }
  0x37   :  { %v82_v17 = vmul.f32 %v80_v15, %v72_v7 }
  0x38   :  { %v83_v18 = vmul.f32 %v81_v16, %v81_v16 }
  0x39   :  { %v84_v19 = vmul.f32 %v82_v17, %v82_v17 }
  0x3b   :  { %v86_v20 = vadd.f32 %v84_v19, %v83_v18 }
  0x3d   :  { %88 = vst [vmem:[#allocation7] sm:$0xff] %v86_v20 }
  0x3e   :  { %170 = shalt.err (!%p167_p0)
}
  0x3f   :  { %98 = dma.vmem_to_hbm [thread:$0]  %s96_s1, 128, %s216_s2, [#allocation4]  }
  0x40   :  { %183 = dma.done.wait [#allocation4], 128  }
  0x41   :  { %184 = vsyncadd [#allocation4], 4294967168 }
  0x42   :  { %102 = vsyncpa [#allocation3], 1 }
  0x43   :  { %103 = vsyncpa [#allocation6], 1 }
  0x44   :  { %104 = vsyncpa [#allocation4], 1 }

</bundles_post_ra>
